<compile_context>
chip_gen: v6e
topology: v6e:2x2x1
jax: 0.10.0
libtpu: 0.0.40
codegen_flags: <defaults>
</compile_context>

<pallas_src>
import jax
import jax.numpy as jnp
from jax.experimental import pallas as pl
from jax.experimental.pallas import tpu as pltpu


def _round_up(x, m):
    return ((x + m - 1) // m) * m


# ----------------------------- controller MLP --------------------------------

def mlp3_pallas(x2d, w1, b1, w2, b2, w3, b3, mxu_dtype=jnp.float32):
    """Controller MLP: [N, hidden] -> [N, num_gen_params], fused in one kernel.

    Output width is padded to a multiple of 128 (lane-dense unmasked stores)
    and sliced back afterwards.
    """
    n = x2d.shape[0]
    out_dim = w3.shape[1]
    out_pad = _round_up(out_dim, 128)
    w3p = jnp.pad(w3, ((0, 0), (0, out_pad - out_dim)))
    b3p = jnp.pad(b3, ((0, out_pad - out_dim),))

    def kernel(x_ref, w1_ref, b1_ref, w2_ref, b2_ref, w3_ref, b3_ref, o_ref):
        x = x_ref[...].astype(mxu_dtype)
        h = jnp.dot(x, w1_ref[...].astype(mxu_dtype),
                    preferred_element_type=jnp.float32) + b1_ref[...]
        h = jnp.maximum(h, 0.0)
        h = jnp.dot(h.astype(mxu_dtype), w2_ref[...].astype(mxu_dtype),
                    preferred_element_type=jnp.float32) + b2_ref[...]
        h = jnp.maximum(h, 0.0)
        o_ref[...] = jnp.dot(h.astype(mxu_dtype), w3_ref[...].astype(mxu_dtype),
                             preferred_element_type=jnp.float32) + b3_ref[...]

    out = pl.pallas_call(
        kernel,
        out_shape=jax.ShapeDtypeStruct((n, out_pad), jnp.float32),
    )(x2d, w1, b1.reshape(1, -1), w2, b2.reshape(1, -1), w3p, b3p.reshape(1, -1))
    return out[:, :out_dim]


# ------------------------- 3x3 conv (transposed dataflow) ---------------------

def conv3x3_pallas(x_nchw, w_hwio, b, skip_nchw=None, apply_relu=True,
                   max_tile_cols=2048, mxu_dtype=jnp.float32,
                   vmem_limit_bytes=32 * 1024 * 1024):
    """3x3 conv (pad=1, stride=1) + optional fused skip-add on the input + bias + ReLU.

    Transposed dataflow: output = [Cout, spatial] with the (padded-flattened)
    spatial dim on the lane axis, grid = (image, row_tile).  Each grid step
    manually DMAs the [Cin, tile + halo] window of the padded flat slab into
    VMEM, builds [9*Cin, Tpad] patches from 9 static lane slices and runs a
    single MXU matmul.  Tpad is a multiple of 128 -> unmasked stores.
    """
    N, Cin, H, W = x_nchw.shape
    Cout = w_hwio.shape[-1]
    Wp = W + 2
    Hw2 = H * Wp

    rows_per_tile = max(1, min(H, max_tile_cols // Wp))
    n_tiles = -(-H // rows_per_tile)
    T = rows_per_tile * Wp                       # useful output cols per tile
    Tpad = _round_up(T, 128)                     # stored (lane-dense) cols per tile
    win = Tpad + 2 * Wp + 2                      # input window incl. 3x3 halo
    Rp_pad = (n_tiles - 1) * T + win             # padded flat slab length

    def _flat_pad(t):
        tp = jnp.pad(t, ((0, 0), (0, 0), (1, 1), (1, 1)))
        tf = tp.reshape(N, Cin, (H + 2) * Wp)
        return jnp.pad(tf, ((0, 0), (0, 0), (0, Rp_pad - (H + 2) * Wp)))

    xf = _flat_pad(x_nchw)
    wt = jnp.transpose(w_hwio.reshape(9 * Cin, Cout)).astype(mxu_dtype)   # [Cout, 9*Cin]
    bcol = b.reshape(Cout, 1)
    offs = tuple(kh * Wp + kw for kh in range(3) for kw in range(3))
    have_skip = skip_nchw is not None

    def kernel(*args):
        if have_skip:
            x_hbm, s_hbm, w_ref, b_ref, o_ref, xbuf, sbuf, sem = args
        else:
            x_hbm, w_ref, b_ref, o_ref, xbuf, sem = args
        n = pl.program_id(0)
        t = pl.program_id(1)
        start = t * T
        # TODO(synk): double-buffer the row-tile window DMAs across grid steps
        # (prefetch tile t+1 while computing tile t) for fully hidden DMA.
        cpx = pltpu.make_async_copy(x_hbm.at[n, :, pl.ds(start, win)], xbuf, sem.at[0])
        cpx.start()
        if have_skip:
            cps = pltpu.make_async_copy(s_hbm.at[n, :, pl.ds(start, win)], sbuf, sem.at[1])
            cps.start()
        cpx.wait()
        x = xbuf[...]
        if have_skip:
            cps.wait()
            # fused residual: conv(x + skip); both zero-padded, so the add
            # commutes with the spatial padding.
            x = x + sbuf[...]
        x = x.astype(mxu_dtype)
        # im2col in VMEM: 9 statically shifted lane slices, sublane-concatenated.
        pats = jnp.concatenate([x[:, off:off + Tpad] for off in offs], axis=0)  # [9*Cin, Tpad]
        acc = jnp.dot(w_ref[...], pats, preferred_element_type=jnp.float32) + b_ref[...]
        if apply_relu:
            acc = jnp.maximum(acc, 0.0)
        o_ref[0, 0] = acc

    inputs = [xf]
    in_specs = [pl.BlockSpec(memory_space=pl.ANY)]
    if have_skip:
        inputs.append(_flat_pad(skip_nchw))
        in_specs.append(pl.BlockSpec(memory_space=pl.ANY))
    inputs += [wt, bcol]
    in_specs += [
        pl.BlockSpec((Cout, 9 * Cin), lambda n, t: (0, 0)),
        pl.BlockSpec((Cout, 1), lambda n, t: (0, 0)),
    ]
    scratch = [pltpu.VMEM((Cin, win), jnp.float32)]
    if have_skip:
        scratch.append(pltpu.VMEM((Cin, win), jnp.float32))
    scratch.append(pltpu.SemaphoreType.DMA((2,)))

    out = pl.pallas_call(
        kernel,
        out_shape=jax.ShapeDtypeStruct((N, n_tiles, Cout, Tpad), jnp.float32),
        grid=(N, n_tiles),
        in_specs=in_specs,
        out_specs=pl.BlockSpec((1, 1, Cout, Tpad), lambda n, t: (n, t, 0, 0)),
        scratch_shapes=scratch,
        compiler_params=pltpu.CompilerParams(
            dimension_semantics=("parallel", "parallel"),
            vmem_limit_bytes=vmem_limit_bytes),
    )(*inputs)

    # stitch tiles: drop the lane padding and the 2 wrap-around columns per row
    out = out[:, :, :, :T]
    out = jnp.transpose(out, (0, 2, 1, 3)).reshape(N, Cout, n_tiles * T)
    out = out[:, :, :Hw2].reshape(N, Cout, H, Wp)[:, :, :, :W]
    return out


# ---------------------------- dynamic mask head --------------------------------

def _choose_hw_tile(hw_pad, cap=2048):
    m = hw_pad // 128
    k = min(m, max(1, cap // 128))
    while m % k:
        k -= 1
    return 128 * k


def dynamic_mask_head_pallas(featA, w0aug, w1bd, b1col, w2mat, b2col,
                             G, DM, HWt, mxu_dtype=jnp.float32,
                             vmem_limit_bytes=32 * 1024 * 1024):
    """Per-instance dynamic 3-layer 1x1-conv head.

    All three layers are dense MXU matmuls per (image, instance-group, HW-tile):
      layer0: [G*DM, C+3] @ [C+3, HWt]   (rel-coord term folded into the weights)
      layer1: [G*DM, G*DM] @ [G*DM, HWt] (block-diagonal per group)
      layer2: [G, G*DM]   @ [G*DM, HWt]  (block "diagonal" row-select per group)
    HWt is a multiple of 128 -> lane-dense stores.
    """
    bs, n_groups = w0aug.shape[:2]
    Caug = featA.shape[1]
    HWp = featA.shape[2]
    GD = G * DM
    n_hw = HWp // HWt

    def kernel(featA_ref, w0_ref, w1_ref, b1_ref, w2_ref, b2_ref, o_ref):
        feats = featA_ref[0]                                                  # [Caug, HWt]
        h = jnp.dot(w0_ref[0, 0], feats, preferred_element_type=jnp.float32)  # [GD, HWt]
        h = jnp.maximum(h, 0.0)
        h2 = jnp.dot(w1_ref[0, 0], h.astype(mxu_dtype),
                     preferred_element_type=jnp.float32) + b1_ref[0, 0]
        h2 = jnp.maximum(h2, 0.0)
        logits = jnp.dot(w2_ref[0, 0], h2.astype(mxu_dtype),
                         preferred_element_type=jnp.float32) + b2_ref[0, 0]   # [G, HWt]
        o_ref[0, 0] = logits

    return pl.pallas_call(
        kernel,
        out_shape=jax.ShapeDtypeStruct((bs, n_groups, G, HWp), jnp.float32),
        grid=(bs, n_groups, n_hw),
        in_specs=[
            pl.BlockSpec((1, Caug, HWt), lambda b, g, t: (b, 0, t)),
            pl.BlockSpec((1, 1, GD, Caug), lambda b, g, t: (b, g, 0, 0)),
            pl.BlockSpec((1, 1, GD, GD), lambda b, g, t: (b, g, 0, 0)),
            pl.BlockSpec((1, 1, GD, 1), lambda b, g, t: (b, g, 0, 0)),
            pl.BlockSpec((1, 1, G, GD), lambda b, g, t: (b, g, 0, 0)),
            pl.BlockSpec((1, 1, G, 1), lambda b, g, t: (b, g, 0, 0)),
        ],
        out_specs=pl.BlockSpec((1, 1, G, HWt), lambda b, g, t: (b, g, 0, t)),
        compiler_params=pltpu.CompilerParams(
            dimension_semantics=("parallel", "parallel", "parallel"),
            vmem_limit_bytes=vmem_limit_bytes),
    )(featA, w0aug, w1bd, b1col, w2mat, b2col)


# ------------------------------- JAX glue -------------------------------------

def compute_locations(h, w, stride=1):
    xs = jnp.arange(w, dtype=jnp.float32) * stride
    ys = jnp.arange(h, dtype=jnp.float32) * stride
    yy, xx = jnp.meshgrid(ys, xs, indexing="ij")
    return jnp.stack([xx.reshape(-1), yy.reshape(-1)], axis=1) + stride // 2   # [H*W, 2]


def _nearest_resize_nchw(x, out_hw):
    H, W = x.shape[2:]
    oh, ow = out_hw
    iy = (jnp.arange(oh) * H // oh).astype(jnp.int32)
    ix = (jnp.arange(ow) * W // ow).astype(jnp.int32)
    return x[:, :, iy][:, :, :, ix]


def _interp1d_align_corners(x, out_size, axis):
    in_size = x.shape[axis]
    src = jnp.arange(out_size, dtype=jnp.float32) * ((in_size - 1) / (out_size - 1))
    i0 = jnp.clip(jnp.floor(src).astype(jnp.int32), 0, in_size - 2)
    w = src - i0.astype(jnp.float32)
    x0 = jnp.take(x, i0, axis=axis)
    x1 = jnp.take(x, i0 + 1, axis=axis)
    shape = [1] * x.ndim
    shape[axis] = out_size
    return x0 * (1.0 - w.reshape(shape)) + x1 * w.reshape(shape)


def aligned_bilinear(t, factor):
    # t: [N, C, H, W]; exact port of the PyTorch helper (replicate pad + align_corners).
    # TODO(synk): fuse the factor-2 upsample into the dynamic-head kernel epilogue
    # on the lane-dense [G, HW] layout instead of this XLA pass.
    if factor == 1:
        return t
    N, C, H, W = t.shape
    tp = jnp.pad(t, ((0, 0), (0, 0), (0, 1), (0, 1)), mode="edge")
    oh, ow = factor * H + 1, factor * W + 1
    tp = _interp1d_align_corners(tp, oh, axis=2)
    tp = _interp1d_align_corners(tp, ow, axis=3)
    tp = jnp.pad(tp, ((0, 0), (0, 0), (factor // 2, 0), (factor // 2, 0)), mode="edge")
    return tp[:, :, :oh - 1, :ow - 1]


# ------------------------------ MaskBranch ------------------------------------

class MaskBranchPallas:
    def __init__(self, hidden_dim, rel_coord=True, use_relative_hw=False,
                 channel_div=32, dy_mask_channel=8, is_concat=True, key=None,
                 mxu_dtype=jnp.float32):
        # mxu_dtype: set to jnp.bfloat16 on v6e/v7x (bf16 MXU path, halved
        # im2col/feature VMEM + DMA bytes); accumulation stays f32 either way.
        assert rel_coord and not use_relative_hw  # default config of the module
        self.rel_coord = rel_coord
        self.is_concat = is_concat
        self.mxu_dtype = mxu_dtype
        self.in_channels = hidden_dim // channel_div
        if is_concat:
            self.in_channels *= 2
        self.dynamic_mask_channels = dy_mask_channel
        self.controller_layers = 3
        self.mask_out_stride = 4
        self.up_rate = 8 // self.mask_out_stride

        weight_nums, bias_nums = [], []
        for l in range(self.controller_layers):
            if l == 0:
                weight_nums.append((self.in_channels + 2) * self.dynamic_mask_channels)
                bias_nums.append(self.dynamic_mask_channels)
            elif l == self.controller_layers - 1:
                weight_nums.append(self.dynamic_mask_channels * 1)
                bias_nums.append(1)
            else:
                weight_nums.append(self.dynamic_mask_channels ** 2)
                bias_nums.append(self.dynamic_mask_channels)
        self.weight_nums = weight_nums
        self.bias_nums = bias_nums
        self.num_gen_params = sum(weight_nums) + sum(bias_nums)

        mask_dim = hidden_dim * 2 if is_concat else hidden_dim
        self.mask_dim = mask_dim
        if key is None:
            key = jax.random.PRNGKey(0)
        ks = jax.random.split(key, 8)

        def uni(k, shape, fan_in):      # deterministic kaiming-style init
            bound = (3.0 / fan_in) ** 0.5
            return jax.random.uniform(k, shape, jnp.float32, -bound, bound)

        # controller = MLP(hidden_dim, hidden_dim, num_gen_params, 3)
        self.c_w1 = uni(ks[0], (hidden_dim, hidden_dim), hidden_dim)
        self.c_b1 = jnp.zeros((hidden_dim,), jnp.float32)
        self.c_w2 = uni(ks[1], (hidden_dim, hidden_dim), hidden_dim)
        self.c_b2 = jnp.zeros((hidden_dim,), jnp.float32)
        self.c_w3 = uni(ks[2], (hidden_dim, self.num_gen_params), hidden_dim)
        self.c_b3 = jnp.zeros((self.num_gen_params,), jnp.float32)

        # MaskHeadSmallConv(mask_dim, fpn_dims=None, context_dim=mask_dim, dim_div=channel_div)
        d = mask_dim
        self.lay3_w = uni(ks[3], (3, 3, d, d), 9 * d); self.lay3_b = jnp.zeros((d,), jnp.float32)
        self.lay4_w = uni(ks[4], (3, 3, d, d), 9 * d); self.lay4_b = jnp.zeros((d,), jnp.float32)
        self.dcn_w = uni(ks[5], (3, 3, d, d), 9 * d); self.dcn_b = jnp.zeros((d,), jnp.float32)
        self.lay1_w = uni(ks[6], (3, 3, d, d // 4), 9 * d); self.lay1_b = jnp.zeros((d // 4,), jnp.float32)
        self.lay2_w = uni(ks[7], (3, 3, d // 4, d // channel_div), 9 * (d // 4))
        self.lay2_b = jnp.zeros((d // channel_div,), jnp.float32)

    # -- MaskHeadSmallConv.forward(x, fpns=None), all NCHW (no layout transposes) --
    def _mask_head(self, feats_nchw_list):
        mxu = self.mxu_dtype
        x3 = feats_nchw_list[-1]
        x2 = feats_nchw_list[-2]
        x1 = feats_nchw_list[-3]
        f = conv3x3_pallas(x3, self.lay3_w, self.lay3_b, mxu_dtype=mxu)
        # skip-adds fused into the conv kernel: conv(x_skip + resize(f))
        # TODO(synk): fold the 2x nearest upsample into the conv's row-window DMA
        # (fetch each source row twice) instead of this XLA resize.
        f = conv3x3_pallas(x2, self.lay4_w, self.lay4_b,
                           skip_nchw=_nearest_resize_nchw(f, x2.shape[2:]), mxu_dtype=mxu)
        f = conv3x3_pallas(x1, self.dcn_w, self.dcn_b,
                           skip_nchw=_nearest_resize_nchw(f, x1.shape[2:]), mxu_dtype=mxu)
        f = conv3x3_pallas(f, self.lay1_w, self.lay1_b, mxu_dtype=mxu)
        f = conv3x3_pallas(f, self.lay2_w, self.lay2_b, mxu_dtype=mxu)
        return f                                                    # [bs, in_channels, H, W]

    def _controller(self, hs_lvl):
        bs, nq, hd = hs_lvl.shape
        out = mlp3_pallas(hs_lvl.reshape(bs * nq, hd),
                          self.c_w1, self.c_b1, self.c_w2, self.c_b2,
                          self.c_w3, self.c_b3, mxu_dtype=self.mxu_dtype)
        return out.reshape(bs, nq, self.num_gen_params)

    # -- dynamic_mask_with_coords + parse_dynamic_params + mask_heads_forward --
    def _dynamic_mask_with_coords(self, mask_feats_nchw, reference_points,
                                  mask_head_params, nq, mask_feat_stride=8):
        bs, C, H, W = mask_feats_nchw.shape
        NI = bs * nq
        DM = self.dynamic_mask_channels
        HW = H * W
        HWp = _round_up(HW, 128)
        G = min(nq, 16)                         # instances per block-diag group
        nq_pad = _round_up(nq, G)
        n_groups = nq_pad // G
        mxu = self.mxu_dtype

        # feature slab augmented with [loc_x; loc_y; 1] rows so the rel-coord
        # term of dynamic layer 0 folds into the shared MXU matmul; lane-padded.
        locs = compute_locations(H, W, stride=mask_feat_stride)               # [HW, 2]
        extra = jnp.concatenate([locs.T, jnp.ones((1, HW), jnp.float32)], axis=0)
        featT = mask_feats_nchw.reshape(bs, C, HW)
        featA = jnp.concatenate([featT, jnp.broadcast_to(extra[None], (bs, 3, HW))], axis=1)
        featA = jnp.pad(featA, ((0, 0), (0, 0), (0, HWp - HW))).astype(mxu)   # [bs, C+3, HWp]

        # parse_dynamic_params -> matmul-ready, group-blocked slabs (one DMA each)
        p = mask_head_params.reshape(bs, nq, self.num_gen_params)
        sizes = self.weight_nums + self.bias_nums
        offs = [0]
        for s in sizes:
            offs.append(offs[-1] + s)
        w0 = p[..., offs[0]:offs[1]].reshape(bs, nq, DM, C + 2)
        w1 = p[..., offs[1]:offs[2]].reshape(bs, nq, DM, DM)
        w2 = p[..., offs[2]:offs[3]].reshape(bs, nq, DM)
        b0 = p[..., offs[3]:offs[4]]                                          # [bs, nq, DM]
        b1 = p[..., offs[4]:offs[5]]                                          # [bs, nq, DM]
        b2 = p[..., offs[5]:offs[6]]                                          # [bs, nq, 1]

        ref_xy = reference_points.reshape(bs, nq, 4)[..., :2]                 # (x, y)
        refx = ref_xy[:, :, None, 0:1]
        refy = ref_xy[:, :, None, 1:2]
        w0x = w0[..., 0:1]
        w0y = w0[..., 1:2]
        const = w0x * refx + w0y * refy + b0[..., None]
        # columns: [feature weights (C), -w0_x, -w0_y, w0_x*ref_x + w0_y*ref_y + b0]
        w0aug = jnp.concatenate([w0[..., 2:], -w0x, -w0y, const], axis=-1)    # [bs, nq, DM, C+3]

        def pad_q(t):
            return jnp.pad(t, ((0, 0), (0, nq_pad - nq)) + ((0, 0),) * (t.ndim - 2))

        w0aug = pad_q(w0aug).reshape(bs, n_groups, G * DM, C + 3)
        w1g = pad_q(w1).reshape(bs, n_groups, G, DM, DM)
        w2g = pad_q(w2).reshape(bs, n_groups, G, DM)
        b1col = pad_q(b1).reshape(bs, n_groups, G * DM, 1)
        b2col = pad_q(b2).reshape(bs, n_groups, G, 1)

        # block-diagonal layer-1 / layer-2 weights -> one dense MXU matmul per group
        eye = jnp.eye(G, dtype=jnp.float32)
        w1bd = jnp.einsum("bgide,ij->bgidje", w1g, eye).reshape(bs, n_groups, G * DM, G * DM)
        w2mat = jnp.einsum("bgie,ij->bgije", w2g, eye).reshape(bs, n_groups, G, G * DM)

        HWt = _choose_hw_tile(HWp)
        logits = dynamic_mask_head_pallas(
            featA, w0aug.astype(mxu), w1bd.astype(mxu), b1col,
            w2mat.astype(mxu), b2col, G, DM, HWt, mxu_dtype=mxu)              # [bs, ng, G, HWp]

        logits = logits.reshape(bs, nq_pad, HWp)[:, :nq, :HW]
        logits = logits.reshape(1, NI, H, W)                                  # NI on the channel dim
        factor = mask_feat_stride // self.mask_out_stride
        logits = aligned_bilinear(logits, factor)
        return logits                                                         # [1, NI, fH, fW]

    def _forward_mask_head(self, src_feats, reference_points, mask_head_params, num_insts):
        mask_feats = self._mask_head(src_feats)
        nq = num_insts[0]
        mask_logits = self._dynamic_mask_with_coords(mask_feats, reference_points,
                                                     mask_head_params, nq, mask_feat_stride=8)
        outs, st = [], 0
        for n in num_insts:
            outs.append(mask_logits[0, st:st + n][:, None])          # [n, 1, 2H, 2W]
            st += n
        return outs

    def __call__(self, hs, memory, references, indices_list, targets):
        # Inference (eval-mode) semantics of MaskBranch.forward.
        # TODO(synk): the self.training branch (gather of Hungarian-matched indices) is not implemented.
        img_sizes = jnp.stack(
            [t["size"][jnp.array([1, 0, 1, 0])] for t in targets]).astype(jnp.float32)   # [bs, 4] = (w,h,w,h)
        outputs_masks, output_params = [], []
        for lvl, _ in enumerate(indices_list):
            params = self._controller(hs[lvl])                                   # [bs, nq, P]
            reference = references[lvl]                                          # [bs, nq, 4]
            reference_points = (reference * img_sizes[:, None, :]).reshape(1, -1, 4)
            bs, nq = params.shape[:2]
            num_insts = [nq] * bs
            mask_head_params = params.reshape(1, bs * nq, self.num_gen_params)
            pred_list = self._forward_mask_head(memory, reference_points,
                                                mask_head_params, num_insts)
            pred_masks = jnp.stack(pred_list)                                    # [bs, nq, 1, 2H, 2W]
            output_params.append(params)
            outputs_masks.append(pred_masks)
        return outputs_masks, output_params


# --------------------------------- main ---------------------------------------

if __name__ == "__main__":
    key = jax.random.PRNGKey(0)
    k_hs, k_m1, k_m2, k_m3, k_ref, k_param = jax.random.split(key, 6)

    hidden_dim, channel_div = 32, 4
    bs, nq, L = 2, 4, 1
    mask_dim = hidden_dim * 2          # is_concat=True -> 64
    H8, W8 = 16, 16                    # stride-8 feature map

    branch = MaskBranchPallas(hidden_dim, rel_coord=True, use_relative_hw=False,
                              channel_div=channel_div, dy_mask_channel=8,
                              is_concat=True, key=k_param,
                              mxu_dtype=jnp.float32)   # jnp.bfloat16 on v6e/v7x

    hs = jax.random.normal(k_hs, (L, bs, nq, hidden_dim), jnp.float32)
    memory = [
        jax.random.normal(k_m1, (bs, mask_dim, H8, W8), jnp.float32),            # x[-3] stride-8
        jax.random.normal(k_m2, (bs, mask_dim, H8 // 2, W8 // 2), jnp.float32),  # x[-2] stride-16
        jax.random.normal(k_m3, (bs, mask_dim, H8 // 4, W8 // 4), jnp.float32),  # x[-1] stride-32
    ]
    references = jax.random.uniform(k_ref, (L, bs, nq, 4), jnp.float32, 0.1, 0.9)
    targets = [{"size": jnp.array([H8 * 8, W8 * 8], jnp.float32)} for _ in range(bs)]
    indices_list = [None] * L          # eval path ignores indices content

    outputs_masks, output_params = branch(hs, memory, references, indices_list, targets)
    jax.block_until_ready(outputs_masks)
    jax.block_until_ready(output_params)

    m = outputs_masks[0]
    assert m.shape == (bs, nq, 1, 2 * H8, 2 * W8), m.shape
    assert output_params[0].shape == (bs, nq, branch.num_gen_params)
    assert bool(jnp.all(jnp.isfinite(m)))
    print("KERNEL_OK")
</pallas_src>

<mosaic_0001>
module attributes {stable_mosaic.version = 11 : i64} {
  func.func @kernel(%arg0: memref<8x32xf32, #tpu.memory_space<vmem>>, %arg1: memref<32x32xf32, #tpu.memory_space<vmem>>, %arg2: memref<1x32xf32, #tpu.memory_space<vmem>>, %arg3: memref<32x32xf32, #tpu.memory_space<vmem>>, %arg4: memref<1x32xf32, #tpu.memory_space<vmem>>, %arg5: memref<32x256xf32, #tpu.memory_space<vmem>>, %arg6: memref<1x256xf32, #tpu.memory_space<vmem>>, %arg7: memref<8x256xf32, #tpu.memory_space<vmem>>) attributes {dimension_semantics = [], scalar_prefetch = 0 : i64, scratch_operands = 0 : i64, tpu.core_type = #tpu.core_type<tc>} {
    %c0 = arith.constant 0 : index
    %c0_0 = arith.constant 0 : index
    %0 = vector.load %arg0[%c0, %c0_0] : memref<8x32xf32, #tpu.memory_space<vmem>>, vector<8x32xf32>
    %c0_1 = arith.constant 0 : index
    %c0_2 = arith.constant 0 : index
    %1 = vector.load %arg1[%c0_1, %c0_2] : memref<32x32xf32, #tpu.memory_space<vmem>>, vector<32x32xf32>
    %cst = arith.constant dense<0.000000e+00> : vector<8x32xf32>
    %2 = tpu.matmul %0, %1, %cst {dimension_numbers = #tpu.dot_dimension_numbers<[1], [0], [0], [1], [0, 0, 1, 1], [], []>} : vector<8x32xf32>, vector<32x32xf32>, vector<8x32xf32> -> vector<8x32xf32>
    %c0_3 = arith.constant 0 : index
    %c0_4 = arith.constant 0 : index
    %3 = vector.load %arg2[%c0_3, %c0_4] : memref<1x32xf32, #tpu.memory_space<vmem>>, vector<1x32xf32>
    %4 = vector.broadcast %3 : vector<1x32xf32> to vector<8x32xf32>
    %5 = arith.addf %2, %4 : vector<8x32xf32>
    %cst_5 = arith.constant 0.000000e+00 : f32
    %6 = vector.broadcast %cst_5 : f32 to vector<8x32xf32>
    %7 = arith.maximumf %5, %6 : vector<8x32xf32>
    %c0_6 = arith.constant 0 : index
    %c0_7 = arith.constant 0 : index
    %8 = vector.load %arg3[%c0_6, %c0_7] : memref<32x32xf32, #tpu.memory_space<vmem>>, vector<32x32xf32>
    %cst_8 = arith.constant dense<0.000000e+00> : vector<8x32xf32>
    %9 = tpu.matmul %7, %8, %cst_8 {dimension_numbers = #tpu.dot_dimension_numbers<[1], [0], [0], [1], [0, 0, 1, 1], [], []>} : vector<8x32xf32>, vector<32x32xf32>, vector<8x32xf32> -> vector<8x32xf32>
    %c0_9 = arith.constant 0 : index
    %c0_10 = arith.constant 0 : index
    %10 = vector.load %arg4[%c0_9, %c0_10] : memref<1x32xf32, #tpu.memory_space<vmem>>, vector<1x32xf32>
    %11 = vector.broadcast %10 : vector<1x32xf32> to vector<8x32xf32>
    %12 = arith.addf %9, %11 : vector<8x32xf32>
    %cst_11 = arith.constant 0.000000e+00 : f32
    %13 = vector.broadcast %cst_11 : f32 to vector<8x32xf32>
    %14 = arith.maximumf %12, %13 : vector<8x32xf32>
    %c0_12 = arith.constant 0 : index
    %c0_13 = arith.constant 0 : index
    %15 = vector.load %arg5[%c0_12, %c0_13] : memref<32x256xf32, #tpu.memory_space<vmem>>, vector<32x256xf32>
    %cst_14 = arith.constant dense<0.000000e+00> : vector<8x256xf32>
    %16 = tpu.matmul %14, %15, %cst_14 {dimension_numbers = #tpu.dot_dimension_numbers<[1], [0], [0], [1], [0, 0, 1, 1], [], []>} : vector<8x32xf32>, vector<32x256xf32>, vector<8x256xf32> -> vector<8x256xf32>
    %c0_15 = arith.constant 0 : index
    %c0_16 = arith.constant 0 : index
    %17 = vector.load %arg6[%c0_15, %c0_16] : memref<1x256xf32, #tpu.memory_space<vmem>>, vector<1x256xf32>
    %18 = vector.broadcast %17 : vector<1x256xf32> to vector<8x256xf32>
    %19 = arith.addf %16, %18 : vector<8x256xf32>
    %c0_17 = arith.constant 0 : index
    %c0_18 = arith.constant 0 : index
    %20 = vector.load %arg7[%c0_17, %c0_18] : memref<8x256xf32, #tpu.memory_space<vmem>>, vector<8x256xf32>
    tpu.vector_store %arg7[%c0_17, %c0_18], %19 {strides = array<i32>} : memref<8x256xf32, #tpu.memory_space<vmem>>, vector<8x256xf32>,
    return
  }
}

</mosaic_0001>

<bundles_post_ra>
// kernel: tpu_custom_call.1
= control target key start
LH: loop header
LB: loop body
LE: loop exit
PB: predicated region body
PF: predicated region fallthrough
CT: control target
= control target key end

     0   :  { %12 = vsyncpa [#allocation3], 0  ;;  %s599_s0 = inlined_call_operand.hbm [shape: f32[8,32], index: 0, kind: input, shape index: {}]   ;;  %s600_s1 = inlined_call_operand.hbm [shape: f32[32,32], index: 1, kind: input, shape index: {}]   ;;  %s601_s2 = inlined_call_operand.vmem [shape: f32[1,32], index: 2, kind: input, shape index: {}]   ;;  %s602_s3 = inlined_call_operand.hbm [shape: f32[32,32], index: 3, kind: input, shape index: {}]   ;;  %s603_s4 = inlined_call_operand.vmem [shape: f32[1,32], index: 4, kind: input, shape index: {}]   ;;  %s604_s5 = inlined_call_operand.hbm [shape: f32[32,256], index: 5, kind: input, shape index: {}]   ;;  %s605_s6 = inlined_call_operand.vmem [shape: f32[1,256], index: 6, kind: input, shape index: {}]   ;;  %s606_s7 = inlined_call_operand.hbm [shape: f32[8,256], index: 7, kind: output, shape index: {}]  }
   0x1   :  { %13 = vsyncpa [#allocation6], 0 }
   0x2   :  { %14 = vsyncpa [#allocation9], 0 }
   0x3   :  { %15 = vsyncpa [#allocation4], 0  ;;  %s521_s24 = smov [#allocation5]  }
   0x4   :  { %s31_s25 = sshll.u32 %s521_s24, 4  ;;  %s32_s25 = int_to_ptr.vmem [resolvable:$true] %s31_s25 }
   0x5   :  { %s421_s26 = scalar_lea.vmem %s32_s25, 512  ;;  %p426_p1 = scmp.lt.s32.totalorder %s32_s25, %s32_s25 }
   0x6   :  { %p422_p0 = scmp.ne.s32.totalorder %s32_s25, %s421_s26  ;;  %p427_p2 = scmp.lt.s32.totalorder %s421_s26, %s421_s26 }
   0x8   :  { %p428_p3 = por %p427_p2, %p426_p1 }
   0xa   :  { %p429_p4 = pnand %p428_p3, %p422_p0 }
   0xc   :  { %432 = shalt.err (!%p429_p4)
}
   0xd   :  { %s522_s27 = smov 128   ;;  %s523_s28 = smov 8  }
   0xe   :  { %37 = dma.hbm_to_vmem [thread:$0]  %s600_s1, 512, %s32_s25, [#allocation6], %s522_s27, %s522_s27, %s523_s28  }
   0xf   :  { %s524_s8 = smov [#allocation2]   ;;  %s525_s10 = smov [#allocation7]  }
  0x10   :  { %s22_s9 = sshll.u32 %s524_s8, 4  ;;  %s45_s11 = sshll.u32 %s525_s10, 4  ;;  %s23_s9 = int_to_ptr.vmem [resolvable:$true] %s22_s9  ;;  %s46_s11 = int_to_ptr.vmem [resolvable:$true] %s45_s11 }
  0x11   :  { %s441_s12 = scalar_lea.vmem %s23_s9, 128  ;;  %p446_p6 = scmp.lt.s32.totalorder %s23_s9, %s23_s9 }
  0x12   :  { %p442_p5 = scmp.ne.s32.totalorder %s23_s9, %s441_s12  ;;  %p447_p7 = scmp.lt.s32.totalorder %s441_s12, %s441_s12 }
  0x14   :  { %p448_p8 = por %p447_p7, %p446_p6 }
  0x16   :  { %p449_p9 = pnand %p448_p8, %p442_p5 }
  0x18   :  { %452 = shalt.err (!%p449_p9)
}
  0x19   :  { %25 = dma.hbm_to_vmem [thread:$0]  %s599_s0, 128, %s23_s9, [#allocation3]  }
  0x1a   :  { %s461_s15 = scalar_lea.vmem %s46_s11, 512  ;;  %p466_p11 = scmp.lt.s32.totalorder %s46_s11, %s46_s11 }
  0x1b   :  { %p462_p10 = scmp.ne.s32.totalorder %s46_s11, %s461_s15  ;;  %p467_p12 = scmp.lt.s32.totalorder %s461_s15, %s461_s15 }
  0x1d   :  { %p468_p13 = por %p467_p12, %p466_p11 }
  0x1f   :  { %p469_p0 = pnand %p468_p13, %p462_p10 }
  0x21   :  { %472 = shalt.err (!%p469_p0)
}
  0x22   :  { %51 = dma.hbm_to_vmem [thread:$0]  %s602_s3, 512, %s46_s11, [#allocation6], %s522_s27, %s522_s27, %s523_s28  }
  0x23   :  { %s526_s17 = smov [#allocation8]  }
  0x24   :  { %s59_s18 = sshll.u32 %s526_s17, 4  ;;  %s60_s18 = int_to_ptr.vmem [resolvable:$true] %s59_s18 }
  0x25   :  { %s481_s19 = scalar_lea.vmem %s60_s18, 1024  ;;  %p486_p2 = scmp.lt.s32.totalorder %s60_s18, %s60_s18 }
  0x26   :  { %p482_p1 = scmp.ne.s32.totalorder %s60_s18, %s481_s19  ;;  %p487_p3 = scmp.lt.s32.totalorder %s481_s19, %s481_s19 }
  0x28   :  { %p488_p4 = por %p487_p3, %p486_p2 }
  0x2a   :  { %p489_p5 = pnand %p488_p4, %p482_p1 }
  0x2c   :  { %492 = shalt.err (!%p489_p5)
}
  0x2d   :  { %s527_s0 = smov 256   ;;  %s528_s20 = smov 16  }
  0x2e   :  { %65 = dma.hbm_to_vmem [thread:$0]  %s604_s5, 1024, %s60_s18, [#allocation9], %s527_s0, %s527_s0, %s528_s20  }
  0x2f   :  { %513 = dma.done.wait [#allocation3], 128  }
  0x30   :  { %514 = vsyncadd [#allocation3], 4294967168 }
  0x31   :  { %515 = dma.done.wait [#allocation6], 1024  }
  0x32   :  { %516 = vsyncadd [#allocation6], 4294966272 }
  0x33   :  { %517 = dma.done.wait [#allocation9], 1024  }
  0x34   :  { %518 = vsyncadd [#allocation9], 4294966272  ;;  %v529_v0 = vmov 0.0   ;;  %vm530_vm0 = vmmov 0   ;;  %v84_v1 = vld [vmem:[#allocation5 + $0x18] sm:$0xff]  ;;  %v83_v2 = vld [vmem:[#allocation5 + $0x10] sm:$0xff]  ;;  %v262_v28 = vlaneseq }
  0x35   :  { %380 = vmatprep.subr.mxu0 %v529_v0  ;;  %388 = vmatprep.mubr.msk.f32.mxu0 %vm530_vm0, %v529_v0  ;;  %v170_v3 = vld [vmem:[#allocation7 + $0x18] sm:$0xff]  ;;  %v82_v4 = vld [vmem:[#allocation5 + $0x8] sm:$0xff]  ;;  %v81_v5 = vld [vmem:[#allocation5] sm:$0xff]  ;;  %vm92_vm1 = vcmask 261120   ;;  %s531_s26 = smov [#allocation10]  }
  0x36   :  { %391 = vmatprep.subr.mxu1 %v529_v0  ;;  %399 = vmatprep.mubr.msk.f32.mxu1 %vm530_vm0, %v529_v0  ;;  %v80_v6 = vld [vmem:[#allocation2] sm:$0xff]  ;;  %v169_v7 = vld [vmem:[#allocation7 + $0x10] sm:$0xff]  ;;  %v168_v8 = vld [vmem:[#allocation7 + $0x8] sm:$0xff]  ;;  %v263_v29 = vshrl.u32 %v262_v28, 7  ;;  %s354_s27 = sshll.u32 %s531_s26, 4  ;;  %s355_s27 = int_to_ptr.vmem [resolvable:$true] %s354_s27 }
  0x37   :  { %381 = vmatpush3.msra.mxu0 %v84_v1  ;;  %392 = vmatpush3.msra.mxu1 %v170_v3  ;;  %v167_v9 = vld [vmem:[#allocation7] sm:$0xff]  ;;  %v259_v10 = vld [vmem:[#allocation8 + $0x38] sm:$0xff]  ;;  %v258_v11 = vld [vmem:[#allocation8 + $0x30] sm:$0xff]  ;;  %p498_p7 = scmp.lt.s32.totalorder %s355_s27, %s355_s27 }
  0x38   :  { %382 = vmatprep.subr.mxu0 %v529_v0  ;;  %393 = vmatprep.subr.mxu1 %v529_v0  ;;  %v257_v12 = vld [vmem:[#allocation8 + $0x28] sm:$0xff]  ;;  %v365_v13 = vld [vmem:[%s601_s2] ss:$0 sm:$0xff]  ;;  %v256_v18 = vld [vmem:[#allocation8 + $0x20] sm:$0xff]  ;;  %v264_v30 = vsub.s32 0, %v263_v29  ;;  %v268_v32 = vsub.s32 1, %v263_v29 }
  0x39   :  { %383 = vmatpush3.msra.mxu0 %v83_v2  ;;  %394 = vmatpush3.msra.mxu1 %v169_v7  ;;  %v255_v19 = vld [vmem:[#allocation8 + $0x18] sm:$0xff]  ;;  %v254_v20 = vld [vmem:[#allocation8 + $0x10] sm:$0xff]  ;;  %v253_v21 = vld [vmem:[#allocation8 + $0x8] sm:$0xff] }
  0x3a   :  { %384 = vmatprep.subr.mxu0 %v529_v0  ;;  %395 = vmatprep.subr.mxu1 %v529_v0  ;;  %v252_v22 = vld [vmem:[#allocation8] sm:$0xff]  ;;  %v367_v23 = vld [vmem:[%s603_s4] ss:$0 sm:$0xff]  ;;  %s493_s4 = scalar_lea.vmem %s355_s27, 256 }
  0x3b   :  { %385 = vmatpush3.msra.mxu0 %v82_v4  ;;  %396 = vmatpush3.msra.mxu1 %v168_v8  ;;  %v260_v31 = vld [vmem:[%s605_s6] sm:$0x3]  ;;  %p494_p6 = scmp.ne.s32.totalorder %s355_s27, %s493_s4  ;;  %p499_p8 = scmp.lt.s32.totalorder %s493_s4, %s493_s4 }
  0x3c   :  { %386 = vmatprep.subr.mxu0 %v529_v0  ;;  %397 = vmatprep.subr.mxu1 %v529_v0  ;;  %v265_v33 = vrot.slane %v260_v31, %v264_v30  ;;  %v269_v34 = vrot.slane %v260_v31, %v268_v32 }
  0x3d   :  { %387 = vmatpush3.msra.mxu0 %v81_v5  ;;  %398 = vmatpush3.msra.mxu1 %v167_v9  ;;  %p500_p9 = por %p499_p8, %p498_p7 }
  0x3e   :  { %389 = vmatmul.mubr.msk.f32.vlgmr.msra.gmra.mxu0 %vm92_vm1, %v80_v6  ;;  %299 = vmatprep.subr.mxu0 %v259_v10 }
  0x3f   :  { %339 = vmatprep.mubr.f32.mxu0 %v529_v0  ;;  %300 = vmatpush1.msra.mxu0 %v258_v11  ;;  %p501_p10 = pnand %p500_p9, %p494_p6 }
  0x40   :  { %301 = vmatprep.subr.mxu0 %v257_v12 }
  0x41   :  { %302 = vmatpush1.msra.mxu0 %v256_v18 }
  0x42   :  { %303 = vmatprep.subr.mxu0 %v255_v19 }
  0x43   :  { %304 = vmatpush1.msra.mxu0 %v254_v20 }
  0x44   :  { %305 = vmatprep.subr.mxu0 %v253_v21 }
  0x45   :  { %306 = vmatpush1.msra.mxu0 %v252_v22 }
  0xfe   :  { %v162_v14 = vpop.f32.mrf.mxu0 }
  0xff   :  { %v163_v15 = vadd.f32 %v365_v13, %v162_v14 }
 0x100   :  { %v390_v16 = vpop.f32.mrf.mxu0 }
 0x101   :  { %v166_v17 = vmax.f32 %v163_v15, 0.0 }
 0x103   :  { %400 = vmatmul.mubr.msk.f32.vlgmr.msra.gmra.mxu1 %vm92_vm1, %v166_v17 }
 0x1c3   :  { %v247_v24 = vpop.f32.mrf.mxu1 }
 0x1c4   :  { %v248_v25 = vadd.f32 %v367_v23, %v247_v24 }
 0x1c5   :  { %v401_v26 = vpop.f32.mrf.mxu1 }
 0x1c6   :  { %v251_v27 = vmax.f32 %v248_v25, 0.0 }
 0x1c8   :  { %369 = vmatmul.mubr.msk.f32.vlgmr.msra.gmra.mxu0 %vm92_vm1, %v251_v27 }
 0x288   :  { %v341_v35 = vpop.f32.mrf.mxu0 }
 0x289   :  { %v342_v36 = vadd.f32 %v341_v35, %v265_v33 }
 0x28a   :  { %v343_v37 = vpop.f32.mrf.mxu0 }
 0x28b   :  { %346 = vst [vmem:[#allocation10] sm:$0xff] %v342_v36  ;;  %v344_v38 = vadd.f32 %v343_v37, %v269_v34 }
 0x28d   :  { %347 = vst [vmem:[#allocation10 + $0x8] sm:$0xff] %v344_v38 }
 0x28e   :  { %504 = shalt.err (!%p501_p10)
}
 0x28f   :  { %357 = dma.vmem_to_hbm [thread:$0]  %s355_s27, 256, %s606_s7, [#allocation4]  }
 0x290   :  { %519 = dma.done.wait [#allocation4], 256  }
 0x291   :  { %520 = vsyncadd [#allocation4], 4294967040 }
 0x292   :  { %361 = vsyncpa [#allocation3], 1 }
 0x293   :  { %362 = vsyncpa [#allocation6], 1 }
 0x294   :  { %363 = vsyncpa [#allocation9], 1 }
 0x295   :  { %364 = vsyncpa [#allocation4], 1 }

</bundles_post_ra>
